<compile_context>
chip_gen: v7x
topology: tpu7x:2x2x1
jax: 0.10.0
libtpu: 0.0.40
codegen_flags: <defaults>
</compile_context>

<pallas_src>
import functools
import math

import jax
import jax.numpy as jnp
from jax import lax
from jax.experimental import pallas as pl
from jax.experimental.pallas import tpu as pltpu

RWKV_K_CLAMP = 60.0


def rwkv_timemix_kernel(x_ref, cx_ref, cp_ref, cn_ref, ew_ref, eu_ref,
                        wkvr_ref, wo_ref, out_ref,
                        k_scr, kv_scr, wkv_scr, *, chunk):
    # One grid program handles one batch element.
    x = x_ref[0].astype(jnp.float32)                     # (T, C)
    T, C = x.shape

    # ---- token shift / mixing, built in-kernel (XLU roll + sublane masks). ----
    t_idx = lax.broadcasted_iota(jnp.int32, (T, 1), 0)
    not_first = (t_idx > 0).astype(jnp.float32)          # zero at t = 0
    not_last = (t_idx < T - 1).astype(jnp.float32)       # zero at t = T-1
    xp = pltpu.roll(x, 1, axis=0) * not_first            # x[t-1]
    xn = pltpu.roll(x, T - 1, axis=0) * not_last         # x[t+1]

    # xx = x*tmix + x[t-1]*(1-tmix) + comb*cmix, with the half/half comb folded into
    # precomputed per-channel coefficients (cx, cp, cn).
    xx = (x * cx_ref[...] + xp * cp_ref[...] + xn * cn_ref[...]).astype(jnp.bfloat16)

    # ---- fused k/v/r projection: one bf16 MXU pass. ----
    kvr = jnp.dot(xx, wkvr_ref[...], preferred_element_type=jnp.float32)   # (T, 3C)
    k = jnp.exp(jnp.minimum(kvr[:, :C], RWKV_K_CLAMP))    # k = exp(clamp(k, max=60))
    v = kvr[:, C:2 * C]
    r = kvr[:, 2 * C:]

    kv = k * v
    k_scr[...] = k
    kv_scr[...] = kv

    ew = ew_ref[...]   # (1, C) per-step decay factor  exp(-time_decay / T)
    eu = eu_ref[...]   # (1, C) current-token bonus    exp(time_first / T)

    # ---- WKV recurrence over T, processed in (chunk, C) groups.
    # Only aa/bb fma updates live on the serial chain; eu-scaling, adds and the
    # divide are full-width chunk ops, stores are unmasked (chunk, C).
    def chunk_body(c, carry):
        aa, bb = carry
        base = pl.multiple_of(c * chunk, chunk)
        k_blk = k_scr[pl.ds(base, chunk), :]
        kv_blk = kv_scr[pl.ds(base, chunk), :]
        aa_rows = []
        bb_rows = []
        for j in range(chunk):
            aa_rows.append(aa)
            bb_rows.append(bb)
            aa = ew * aa + kv_blk[j:j + 1, :]
            bb = ew * bb + k_blk[j:j + 1, :]
        aa_blk = jnp.concatenate(aa_rows, axis=0)          # states *before* each step
        bb_blk = jnp.concatenate(bb_rows, axis=0)
        num = aa_blk + eu * kv_blk
        den = bb_blk + eu * k_blk
        wkv_scr[pl.ds(base, chunk), :] = num * pl.reciprocal(den, approx=True)
        return aa, bb

    zero = jnp.zeros((1, C), jnp.float32)
    lax.fori_loop(0, T // chunk, chunk_body, (zero, zero))

    # ---- gate + output projection (bf16 MXU, f32 accumulate). ----
    rwkv = (jax.nn.sigmoid(r) * wkv_scr[...]).astype(jnp.bfloat16)
    out_ref[0] = jnp.dot(rwkv, wo_ref[...],
                         preferred_element_type=jnp.float32).astype(out_ref.dtype)


def rwkv_timemix(x, params):
    """Forward pass of RWKV_TimeMix. x: (B, T, C) float32."""
    B, T, C = x.shape
    half = C // 2

    # Per-channel scalars, precomputed once (tiny (1, C) ops in the wrapper).
    w = (params["time_decay"].reshape(1, C) / T).astype(jnp.float32)
    u = (params["time_first"].reshape(1, C) / T).astype(jnp.float32)
    ew = jnp.exp(-w)
    eu = jnp.exp(u)

    tmix = params["time_mix"].reshape(1, C).astype(jnp.float32)
    cmix = params["combined_mix"].reshape(1, C).astype(jnp.float32)
    lane = jnp.arange(C)[None, :]
    cmix_lo = jnp.where(lane < half, cmix, 0.0)   # combined-mix coeff on x[t-1] half
    cmix_hi = jnp.where(lane >= half, cmix, 0.0)  # combined-mix coeff on x[t+1] half
    coef_x = tmix
    coef_prev = (1.0 - tmix) + cmix_lo
    coef_next = cmix_hi

    # nn.Linear stores (out, in); pass (in, out). Fuse k/v/r into one (C, 3C) bf16 weight.
    wkvr = jnp.concatenate(
        [params["key_w"].T, params["value_w"].T, params["receptance_w"].T],
        axis=1).astype(jnp.bfloat16)
    wo = params["output_w"].T.astype(jnp.bfloat16)

    chunk = 8 if T % 8 == 0 else 1

    act_spec = pl.BlockSpec((1, T, C), lambda b: (b, 0, 0))
    vec_spec = pl.BlockSpec((1, C), lambda b: (0, 0))
    wkvr_spec = pl.BlockSpec((C, 3 * C), lambda b: (0, 0))
    wo_spec = pl.BlockSpec((C, C), lambda b: (0, 0))

    # Size the scoped VMEM limit from the actual tile footprint (with headroom),
    # never below the common default and never above v7x's physical 64 MiB.
    vmem_bytes = (
        4 * T * C * 4                    # x in + out blocks, double-buffered
        + 2 * (3 * C * C + C * C) * 2    # bf16 fused-kvr + wo weights, double-buffered
        + 3 * T * C * 4                  # k / kv / wkv scratch
        + T * 3 * C * 4                  # kvr intermediate
        + (1 << 20)                      # vec params + temporaries
    )
    vmem_limit = int(min(max(vmem_bytes * 2, 32 << 20), 64 << 20))

    return pl.pallas_call(
        functools.partial(rwkv_timemix_kernel, chunk=chunk),
        out_shape=jax.ShapeDtypeStruct((B, T, C), jnp.float32),
        grid_spec=pltpu.PrefetchScalarGridSpec(
            num_scalar_prefetch=0,
            grid=(B,),
            in_specs=[act_spec,
                      vec_spec, vec_spec, vec_spec, vec_spec, vec_spec,
                      wkvr_spec, wo_spec],
            out_specs=act_spec,
            scratch_shapes=[pltpu.VMEM((T, C), jnp.float32),   # k
                            pltpu.VMEM((T, C), jnp.float32),   # k*v
                            pltpu.VMEM((T, C), jnp.float32)],  # wkv
        ),
        compiler_params=pltpu.CompilerParams(
            dimension_semantics=("parallel",),
            vmem_limit_bytes=vmem_limit,
        ),
    )(x, coef_x, coef_prev, coef_next, ew, eu, wkvr, wo)


def init_params(key, n_embd, n_layer=4, layer_id=1):
    """Deterministic parameter init mirroring RWKV_TimeMix.__init__ (attn_sz == n_embd)."""
    C = n_embd
    first_sa_layer_id = 1
    f1 = 3.0 + (layer_id - first_sa_layer_id) / (n_layer - 1 - first_sa_layer_id) * (1.2 - 3.0)
    f2 = 0.65 + (layer_id - first_sa_layer_id) / (n_layer - 1 - first_sa_layer_id) * (0.4 - 0.65)
    if layer_id == first_sa_layer_id:
        f1 += 0.5
    if layer_id == n_layer - 2:
        f2 = 0.4
    if layer_id == n_layer - 1:
        f2 = 0.37
    h = jnp.arange(C, dtype=jnp.float32)
    decay_speed = jnp.power(f2, h / (C - 1) * 7) * f1
    time_decay = jnp.log(decay_speed)                             # (C,)
    time_first = jnp.full((C,), math.log(0.3), jnp.float32)       # (C,)
    time_mix = jnp.concatenate(
        [jnp.zeros((C // 2,), jnp.float32), jnp.ones((C - C // 2,), jnp.float32)])
    combined_mix = jnp.full((C,), 0.01, jnp.float32)

    ks = jax.random.split(key, 4)
    scale = 1.0 / math.sqrt(C)
    key_w = jax.random.uniform(ks[0], (C, C), jnp.float32, -scale, scale)
    value_w = jax.random.uniform(ks[1], (C, C), jnp.float32, -scale, scale)
    receptance_w = jax.random.uniform(ks[2], (C, C), jnp.float32, -scale, scale)
    output_w = jax.random.uniform(ks[3], (C, C), jnp.float32, -scale, scale)

    return dict(time_decay=time_decay, time_first=time_first,
                time_mix=time_mix, combined_mix=combined_mix,
                key_w=key_w, value_w=value_w,
                receptance_w=receptance_w, output_w=output_w)


if __name__ == "__main__":
    # Small but TPU-friendly shapes: C multiple of 128 (lane-dense), T multiple of 8.
    B, T, C = 2, 16, 128
    root = jax.random.PRNGKey(0)
    kx, kp = jax.random.split(root)
    x = jax.random.normal(kx, (B, T, C), jnp.float32)
    params = init_params(kp, C, n_layer=4, layer_id=1)

    y = rwkv_timemix(x, params)
    y = jax.block_until_ready(y)

    assert y.shape == (B, T, C), y.shape
    assert bool(jnp.all(jnp.isfinite(y)))
    print("KERNEL_OK")
</pallas_src>

<mosaic_0001>
module attributes {stable_mosaic.version = 11 : i64} {
  func.func @rwkv_timemix_kernel(%arg0: i32, %arg1: memref<1x16x128xf32, #tpu.memory_space<vmem>>, %arg2: memref<1x128xf32, #tpu.memory_space<vmem>>, %arg3: memref<1x128xf32, #tpu.memory_space<vmem>>, %arg4: memref<1x128xf32, #tpu.memory_space<vmem>>, %arg5: memref<1x128xf32, #tpu.memory_space<vmem>>, %arg6: memref<1x128xf32, #tpu.memory_space<vmem>>, %arg7: memref<128x384xbf16, #tpu.memory_space<vmem>>, %arg8: memref<128x128xbf16, #tpu.memory_space<vmem>>, %arg9: memref<1x16x128xf32, #tpu.memory_space<vmem>>, %arg10: memref<16x128xf32, #tpu.memory_space<vmem>>, %arg11: memref<16x128xf32, #tpu.memory_space<vmem>>, %arg12: memref<16x128xf32, #tpu.memory_space<vmem>>) attributes {dimension_semantics = [#tpu.dimension_semantics<parallel>], iteration_bounds = array<i64: 2>, scalar_prefetch = 0 : i64, scratch_operands = 3 : i64, tpu.core_type = #tpu.core_type<tc>, window_params = [{transform_indices = @transform_0, window_bounds = array<i64: 1, 16, 128>}, {pipeline_mode = #tpu.pipeline_mode<synchronous>, transform_indices = @transform_1, window_bounds = array<i64: 1, 128>}, {pipeline_mode = #tpu.pipeline_mode<synchronous>, transform_indices = @transform_2, window_bounds = array<i64: 1, 128>}, {pipeline_mode = #tpu.pipeline_mode<synchronous>, transform_indices = @transform_3, window_bounds = array<i64: 1, 128>}, {pipeline_mode = #tpu.pipeline_mode<synchronous>, transform_indices = @transform_4, window_bounds = array<i64: 1, 128>}, {pipeline_mode = #tpu.pipeline_mode<synchronous>, transform_indices = @transform_5, window_bounds = array<i64: 1, 128>}, {pipeline_mode = #tpu.pipeline_mode<synchronous>, transform_indices = @transform_6, window_bounds = array<i64: 128, 384>}, {pipeline_mode = #tpu.pipeline_mode<synchronous>, transform_indices = @transform_7, window_bounds = array<i64: 128, 128>}, {transform_indices = @transform_8, window_bounds = array<i64: 1, 16, 128>}]} {
    %c0 = arith.constant 0 : index
    %c0_0 = arith.constant 0 : index
    %c0_1 = arith.constant 0 : index
    %0 = vector.load %arg1[%c0, %c0_0, %c0_1] : memref<1x16x128xf32, #tpu.memory_space<vmem>>, vector<1x16x128xf32>
    %1 = vector.shape_cast %0 : vector<1x16x128xf32> to vector<16x128xf32>
    %2 = tpu.iota {dimensions = array<i32: 0>} : vector<16x1xi32>
    %c0_i32 = arith.constant 0 : i32
    %3 = vector.broadcast %c0_i32 : i32 to vector<16x1xi32>
    %4 = arith.cmpi sgt, %2, %3 : vector<16x1xi32>
    %5 = arith.extui %4 : vector<16x1xi1> to vector<16x1xi32>
    %6 = arith.sitofp %5 : vector<16x1xi32> to vector<16x1xf32>
    %c15_i32 = arith.constant 15 : i32
    %7 = vector.broadcast %c15_i32 : i32 to vector<16x1xi32>
    %8 = arith.cmpi slt, %2, %7 : vector<16x1xi32>
    %9 = arith.extui %8 : vector<16x1xi1> to vector<16x1xi32>
    %10 = arith.sitofp %9 : vector<16x1xi32> to vector<16x1xf32>
    %c1_i32 = arith.constant 1 : i32
    %11 = tpu.dynamic_rotate %1 by %c1_i32 dim 0 : vector<16x128xf32>, i32 -> vector<16x128xf32>
    %12 = vector.broadcast %6 : vector<16x1xf32> to vector<16x128xf32>
    %13 = arith.mulf %11, %12 : vector<16x128xf32>
    %c15_i32_2 = arith.constant 15 : i32
    %14 = tpu.dynamic_rotate %1 by %c15_i32_2 dim 0 : vector<16x128xf32>, i32 -> vector<16x128xf32>
    %15 = vector.broadcast %10 : vector<16x1xf32> to vector<16x128xf32>
    %16 = arith.mulf %14, %15 : vector<16x128xf32>
    %c0_3 = arith.constant 0 : index
    %c0_4 = arith.constant 0 : index
    %17 = vector.load %arg2[%c0_3, %c0_4] : memref<1x128xf32, #tpu.memory_space<vmem>>, vector<1x128xf32>
    %18 = vector.broadcast %17 : vector<1x128xf32> to vector<16x128xf32>
    %19 = arith.mulf %1, %18 : vector<16x128xf32>
    %c0_5 = arith.constant 0 : index
    %c0_6 = arith.constant 0 : index
    %20 = vector.load %arg3[%c0_5, %c0_6] : memref<1x128xf32, #tpu.memory_space<vmem>>, vector<1x128xf32>
    %21 = vector.broadcast %20 : vector<1x128xf32> to vector<16x128xf32>
    %22 = arith.mulf %13, %21 : vector<16x128xf32>
    %23 = arith.addf %19, %22 : vector<16x128xf32>
    %c0_7 = arith.constant 0 : index
    %c0_8 = arith.constant 0 : index
    %24 = vector.load %arg4[%c0_7, %c0_8] : memref<1x128xf32, #tpu.memory_space<vmem>>, vector<1x128xf32>
    %25 = vector.broadcast %24 : vector<1x128xf32> to vector<16x128xf32>
    %26 = arith.mulf %16, %25 : vector<16x128xf32>
    %27 = arith.addf %23, %26 : vector<16x128xf32>
    %28 = arith.truncf %27 : vector<16x128xf32> to vector<16x128xbf16>
    %c0_9 = arith.constant 0 : index
    %c0_10 = arith.constant 0 : index
    %29 = vector.load %arg7[%c0_9, %c0_10] : memref<128x384xbf16, #tpu.memory_space<vmem>>, vector<128x384xbf16>
    %cst = arith.constant dense<0.000000e+00> : vector<16x384xf32>
    %30 = tpu.matmul %28, %29, %cst {dimension_numbers = #tpu.dot_dimension_numbers<[1], [0], [0], [1], [0, 0, 1, 1], [], []>} : vector<16x128xbf16>, vector<128x384xbf16>, vector<16x384xf32> -> vector<16x384xf32>
    %31 = vector.extract_strided_slice %30 {offsets = [0, 0], sizes = [16, 128], strides = [1, 1]} : vector<16x384xf32> to vector<16x128xf32>
    %cst_11 = arith.constant 6.000000e+01 : f32
    %32 = vector.broadcast %cst_11 : f32 to vector<16x128xf32>
    %33 = arith.minimumf %31, %32 : vector<16x128xf32>
    %34 = math.exp %33 : vector<16x128xf32>
    %35 = vector.extract_strided_slice %30 {offsets = [0, 128], sizes = [16, 128], strides = [1, 1]} : vector<16x384xf32> to vector<16x128xf32>
    %36 = vector.extract_strided_slice %30 {offsets = [0, 256], sizes = [16, 128], strides = [1, 1]} : vector<16x384xf32> to vector<16x128xf32>
    %37 = arith.mulf %34, %35 : vector<16x128xf32>
    %c0_12 = arith.constant 0 : index
    %c0_13 = arith.constant 0 : index
    %38 = vector.load %arg10[%c0_12, %c0_13] : memref<16x128xf32, #tpu.memory_space<vmem>>, vector<16x128xf32>
    tpu.vector_store %arg10[%c0_12, %c0_13], %34 {strides = array<i32>} : memref<16x128xf32, #tpu.memory_space<vmem>>, vector<16x128xf32>,
    %c0_14 = arith.constant 0 : index
    %c0_15 = arith.constant 0 : index
    %39 = vector.load %arg11[%c0_14, %c0_15] : memref<16x128xf32, #tpu.memory_space<vmem>>, vector<16x128xf32>
    tpu.vector_store %arg11[%c0_14, %c0_15], %37 {strides = array<i32>} : memref<16x128xf32, #tpu.memory_space<vmem>>, vector<16x128xf32>,
    %c0_16 = arith.constant 0 : index
    %c0_17 = arith.constant 0 : index
    %40 = vector.load %arg5[%c0_16, %c0_17] : memref<1x128xf32, #tpu.memory_space<vmem>>, vector<1x128xf32>
    %c0_18 = arith.constant 0 : index
    %c0_19 = arith.constant 0 : index
    %41 = vector.load %arg6[%c0_18, %c0_19] : memref<1x128xf32, #tpu.memory_space<vmem>>, vector<1x128xf32>
    %cst_20 = arith.constant 0.000000e+00 : f32
    %42 = vector.broadcast %cst_20 : f32 to vector<1x128xf32>
    %c0_i32_21 = arith.constant 0 : i32
    %c2_i32 = arith.constant 2 : i32
    %43 = arith.addi %c0_i32_21, %c2_i32 : i32
    %c1_i32_22 = arith.constant 1 : i32
    %44:2 = scf.for %arg13 = %c0_i32_21 to %43 step %c1_i32_22 iter_args(%arg14 = %42, %arg15 = %42) -> (vector<1x128xf32>, vector<1x128xf32>)  : i32 {
      %c8_i32 = arith.constant 8 : i32
      %58 = arith.muli %arg13, %c8_i32 : i32
      %59 = tpu.assume_multiple %58, 8 : i32
      %60 = arith.index_cast %59 : i32 to index
      %c0_33 = arith.constant 0 : index
      %61 = vector.load %arg10[%60, %c0_33] : memref<16x128xf32, #tpu.memory_space<vmem>>, vector<8x128xf32>
      %62 = arith.index_cast %59 : i32 to index
      %c0_34 = arith.constant 0 : index
      %63 = vector.load %arg11[%62, %c0_34] : memref<16x128xf32, #tpu.memory_space<vmem>>, vector<8x128xf32>
      %64 = arith.mulf %40, %arg14 : vector<1x128xf32>
      %65 = vector.extract_strided_slice %63 {offsets = [0, 0], sizes = [1, 128], strides = [1, 1]} : vector<8x128xf32> to vector<1x128xf32>
      %66 = arith.addf %64, %65 : vector<1x128xf32>
      %67 = arith.mulf %40, %arg15 : vector<1x128xf32>
      %68 = vector.extract_strided_slice %61 {offsets = [0, 0], sizes = [1, 128], strides = [1, 1]} : vector<8x128xf32> to vector<1x128xf32>
      %69 = arith.addf %67, %68 : vector<1x128xf32>
      %70 = arith.mulf %40, %66 : vector<1x128xf32>
      %71 = vector.extract_strided_slice %63 {offsets = [1, 0], sizes = [1, 128], strides = [1, 1]} : vector<8x128xf32> to vector<1x128xf32>
      %72 = arith.addf %70, %71 : vector<1x128xf32>
      %73 = arith.mulf %40, %69 : vector<1x128xf32>
      %74 = vector.extract_strided_slice %61 {offsets = [1, 0], sizes = [1, 128], strides = [1, 1]} : vector<8x128xf32> to vector<1x128xf32>
      %75 = arith.addf %73, %74 : vector<1x128xf32>
      %76 = arith.mulf %40, %72 : vector<1x128xf32>
      %77 = vector.extract_strided_slice %63 {offsets = [2, 0], sizes = [1, 128], strides = [1, 1]} : vector<8x128xf32> to vector<1x128xf32>
      %78 = arith.addf %76, %77 : vector<1x128xf32>
      %79 = arith.mulf %40, %75 : vector<1x128xf32>
      %80 = vector.extract_strided_slice %61 {offsets = [2, 0], sizes = [1, 128], strides = [1, 1]} : vector<8x128xf32> to vector<1x128xf32>
      %81 = arith.addf %79, %80 : vector<1x128xf32>
      %82 = arith.mulf %40, %78 : vector<1x128xf32>
      %83 = vector.extract_strided_slice %63 {offsets = [3, 0], sizes = [1, 128], strides = [1, 1]} : vector<8x128xf32> to vector<1x128xf32>
      %84 = arith.addf %82, %83 : vector<1x128xf32>
      %85 = arith.mulf %40, %81 : vector<1x128xf32>
      %86 = vector.extract_strided_slice %61 {offsets = [3, 0], sizes = [1, 128], strides = [1, 1]} : vector<8x128xf32> to vector<1x128xf32>
      %87 = arith.addf %85, %86 : vector<1x128xf32>
      %88 = arith.mulf %40, %84 : vector<1x128xf32>
      %89 = vector.extract_strided_slice %63 {offsets = [4, 0], sizes = [1, 128], strides = [1, 1]} : vector<8x128xf32> to vector<1x128xf32>
      %90 = arith.addf %88, %89 : vector<1x128xf32>
      %91 = arith.mulf %40, %87 : vector<1x128xf32>
      %92 = vector.extract_strided_slice %61 {offsets = [4, 0], sizes = [1, 128], strides = [1, 1]} : vector<8x128xf32> to vector<1x128xf32>
      %93 = arith.addf %91, %92 : vector<1x128xf32>
      %94 = arith.mulf %40, %90 : vector<1x128xf32>
      %95 = vector.extract_strided_slice %63 {offsets = [5, 0], sizes = [1, 128], strides = [1, 1]} : vector<8x128xf32> to vector<1x128xf32>
      %96 = arith.addf %94, %95 : vector<1x128xf32>
      %97 = arith.mulf %40, %93 : vector<1x128xf32>
      %98 = vector.extract_strided_slice %61 {offsets = [5, 0], sizes = [1, 128], strides = [1, 1]} : vector<8x128xf32> to vector<1x128xf32>
      %99 = arith.addf %97, %98 : vector<1x128xf32>
      %100 = arith.mulf %40, %96 : vector<1x128xf32>
      %101 = vector.extract_strided_slice %63 {offsets = [6, 0], sizes = [1, 128], strides = [1, 1]} : vector<8x128xf32> to vector<1x128xf32>
      %102 = arith.addf %100, %101 : vector<1x128xf32>
      %103 = arith.mulf %40, %99 : vector<1x128xf32>
      %104 = vector.extract_strided_slice %61 {offsets = [6, 0], sizes = [1, 128], strides = [1, 1]} : vector<8x128xf32> to vector<1x128xf32>
      %105 = arith.addf %103, %104 : vector<1x128xf32>
      %106 = arith.mulf %40, %102 : vector<1x128xf32>
      %107 = vector.extract_strided_slice %63 {offsets = [7, 0], sizes = [1, 128], strides = [1, 1]} : vector<8x128xf32> to vector<1x128xf32>
      %108 = arith.addf %106, %107 : vector<1x128xf32>
      %109 = arith.mulf %40, %105 : vector<1x128xf32>
      %110 = vector.extract_strided_slice %61 {offsets = [7, 0], sizes = [1, 128], strides = [1, 1]} : vector<8x128xf32> to vector<1x128xf32>
      %111 = arith.addf %109, %110 : vector<1x128xf32>
      %112 = tpu.concatenate %arg14, %66, %72, %78, %84, %90, %96, %102 in 0 : vector<1x128xf32>, vector<1x128xf32>, vector<1x128xf32>, vector<1x128xf32>, vector<1x128xf32>, vector<1x128xf32>, vector<1x128xf32>, vector<1x128xf32> -> vector<8x128xf32>
      %113 = tpu.concatenate %arg15, %69, %75, %81, %87, %93, %99, %105 in 0 : vector<1x128xf32>, vector<1x128xf32>, vector<1x128xf32>, vector<1x128xf32>, vector<1x128xf32>, vector<1x128xf32>, vector<1x128xf32>, vector<1x128xf32> -> vector<8x128xf32>
      %114 = vector.broadcast %41 : vector<1x128xf32> to vector<8x128xf32>
      %115 = arith.mulf %114, %63 : vector<8x128xf32>
      %116 = arith.addf %112, %115 : vector<8x128xf32>
      %117 = vector.broadcast %41 : vector<1x128xf32> to vector<8x128xf32>
      %118 = arith.mulf %117, %61 : vector<8x128xf32>
      %119 = arith.addf %113, %118 : vector<8x128xf32>
      %120 = tpu.reciprocal %119 {approx = true} : vector<8x128xf32> -> vector<8x128xf32>
      %121 = arith.mulf %116, %120 : vector<8x128xf32>
      %122 = arith.index_cast %59 : i32 to index
      %c0_35 = arith.constant 0 : index
      %123 = vector.load %arg12[%122, %c0_35] : memref<16x128xf32, #tpu.memory_space<vmem>>, vector<8x128xf32>
      tpu.vector_store %arg12[%122, %c0_35], %121 {strides = array<i32>} : memref<16x128xf32, #tpu.memory_space<vmem>>, vector<8x128xf32>,
      scf.yield %108, %111 : vector<1x128xf32>, vector<1x128xf32>
    }
    %c2_i32_23 = arith.constant 2 : i32
    %45 = arith.negf %36 : vector<16x128xf32>
    %46 = math.exp %45 : vector<16x128xf32>
    %cst_24 = arith.constant 1.000000e+00 : f32
    %47 = vector.broadcast %cst_24 : f32 to vector<16x128xf32>
    %48 = arith.addf %47, %46 : vector<16x128xf32>
    %49 = arith.divf %47, %48 : vector<16x128xf32>
    %c0_25 = arith.constant 0 : index
    %c0_26 = arith.constant 0 : index
    %50 = vector.load %arg12[%c0_25, %c0_26] : memref<16x128xf32, #tpu.memory_space<vmem>>, vector<16x128xf32>
    %51 = arith.mulf %49, %50 : vector<16x128xf32>
    %52 = arith.truncf %51 : vector<16x128xf32> to vector<16x128xbf16>
    %c0_27 = arith.constant 0 : index
    %c0_28 = arith.constant 0 : index
    %53 = vector.load %arg8[%c0_27, %c0_28] : memref<128x128xbf16, #tpu.memory_space<vmem>>, vector<128x128xbf16>
    %cst_29 = arith.constant dense<0.000000e+00> : vector<16x128xf32>
    %54 = tpu.matmul %52, %53, %cst_29 {dimension_numbers = #tpu.dot_dimension_numbers<[1], [0], [0], [1], [0, 0, 1, 1], [], []>} : vector<16x128xbf16>, vector<128x128xbf16>, vector<16x128xf32> -> vector<16x128xf32>
    %c0_30 = arith.constant 0 : index
    %c0_31 = arith.constant 0 : index
    %c0_32 = arith.constant 0 : index
    %55 = vector.load %arg9[%c0_30, %c0_31, %c0_32] : memref<1x16x128xf32, #tpu.memory_space<vmem>>, vector<1x16x128xf32>
    %56 = vector.shape_cast %55 : vector<1x16x128xf32> to vector<16x128xf32>
    %57 = vector.shape_cast %54 : vector<16x128xf32> to vector<1x16x128xf32>
    tpu.vector_store %arg9[%c0_30, %c0_31, %c0_32], %57 {strides = array<i32>} : memref<1x16x128xf32, #tpu.memory_space<vmem>>, vector<1x16x128xf32>,
    return
  }
  func.func @transform_0(%arg0: i32) -> (i32, i32, i32) {
    %c0_i32 = arith.constant 0 : i32
    %c0_i32_0 = arith.constant 0 : i32
    %c0_i32_1 = arith.constant 0 : i32
    return %arg0, %c0_i32, %c0_i32_0 : i32, i32, i32
  }
  func.func @transform_1(%arg0: i32) -> (i32, i32) {
    %c0_i32 = arith.constant 0 : i32
    %c0_i32_0 = arith.constant 0 : i32
    %c0_i32_1 = arith.constant 0 : i32
    return %c0_i32, %c0_i32_0 : i32, i32
  }
  func.func @transform_2(%arg0: i32) -> (i32, i32) {
    %c0_i32 = arith.constant 0 : i32
    %c0_i32_0 = arith.constant 0 : i32
    %c0_i32_1 = arith.constant 0 : i32
    return %c0_i32, %c0_i32_0 : i32, i32
  }
  func.func @transform_3(%arg0: i32) -> (i32, i32) {
    %c0_i32 = arith.constant 0 : i32
    %c0_i32_0 = arith.constant 0 : i32
    %c0_i32_1 = arith.constant 0 : i32
    return %c0_i32, %c0_i32_0 : i32, i32
  }
  func.func @transform_4(%arg0: i32) -> (i32, i32) {
    %c0_i32 = arith.constant 0 : i32
    %c0_i32_0 = arith.constant 0 : i32
    %c0_i32_1 = arith.constant 0 : i32
    return %c0_i32, %c0_i32_0 : i32, i32
  }
  func.func @transform_5(%arg0: i32) -> (i32, i32) {
    %c0_i32 = arith.constant 0 : i32
    %c0_i32_0 = arith.constant 0 : i32
    %c0_i32_1 = arith.constant 0 : i32
    return %c0_i32, %c0_i32_0 : i32, i32
  }
  func.func @transform_6(%arg0: i32) -> (i32, i32) {
    %c0_i32 = arith.constant 0 : i32
    %c0_i32_0 = arith.constant 0 : i32
    %c0_i32_1 = arith.constant 0 : i32
    return %c0_i32, %c0_i32_0 : i32, i32
  }
  func.func @transform_7(%arg0: i32) -> (i32, i32) {
    %c0_i32 = arith.constant 0 : i32
    %c0_i32_0 = arith.constant 0 : i32
    %c0_i32_1 = arith.constant 0 : i32
    return %c0_i32, %c0_i32_0 : i32, i32
  }
  func.func @transform_8(%arg0: i32) -> (i32, i32, i32) {
    %c0_i32 = arith.constant 0 : i32
    %c0_i32_0 = arith.constant 0 : i32
    %c0_i32_1 = arith.constant 0 : i32
    return %arg0, %c0_i32, %c0_i32_0 : i32, i32, i32
  }
}

</mosaic_0001>

<bundles_post_ra>
// kernel: tpu_custom_call.1
= control target key start
LH: loop header
LB: loop body
LE: loop exit
PB: predicated region body
PF: predicated region fallthrough
CT: control target
= control target key end

     0   :  { %13 = vsyncpa [#allocation6], 0  ;;  %s2123_s0 = inlined_call_operand.hbm [shape: f32[2,16,128], index: 0, kind: input, shape index: {}]   ;;  %s2124_s1 = inlined_call_operand.vmem [shape: f32[1,128], index: 1, kind: input, shape index: {}]   ;;  %s2125_s2 = inlined_call_operand.vmem [shape: f32[1,128], index: 2, kind: input, shape index: {}]   ;;  %s2126_s3 = inlined_call_operand.vmem [shape: f32[1,128], index: 3, kind: input, shape index: {}]   ;;  %s2127_s4 = inlined_call_operand.vmem [shape: f32[1,128], index: 4, kind: input, shape index: {}]   ;;  %s2128_s5 = inlined_call_operand.vmem [shape: f32[1,128], index: 5, kind: input, shape index: {}]   ;;  %s2129_s6 = inlined_call_operand.hbm [shape: bf16[128,384], index: 6, kind: input, shape index: {}]   ;;  %s2130_s7 = inlined_call_operand.hbm [shape: bf16[128,128], index: 7, kind: input, shape index: {}]   ;;  %s2131_s8 = inlined_call_operand.hbm [shape: f32[2,16,128], index: 8, kind: output, shape index: {}]  }
   0x1   :  { %15 = vsyncpa [#allocation6 + $0x1], 0 }
   0x2   :  { %16 = vsyncpa [#allocation9], 0 }
   0x3   :  { %17 = vsyncpa [#allocation7], 0 }
   0x4   :  { %19 = vsyncpa [#allocation7 + $0x1], 0  ;;  %s1721_s27 = smov 0   ;;  %s1723_s28 = smov 0  }
   0x5   :  { %s1725_s29 = smov 0   ;;  %s1727_s30 = smov 0  }
   0x6 LB: > { %s1742_s9 = sadd.s32 4294967295, %s1646_s30   ;;  %s1200_s10 = sadd.s32 4294967294, %s1646_s30   ;;  %s1646_s30 = sphi %s1727_s30, %s2151_s30   ;;  %s1642_s29 = sphi %s1725_s29, %s2150_s29   ;;  %s1638_s28 = sphi %s1723_s28, %s2149_s28   ;;  %s1634_s27 = sphi %s1721_s27, %s2148_s27  }
   0x7   : > { %p45_p0 = scmp.ne.s32.totalorder %s1638_s28, %s1634_s27  ;;  %p2132_p1 = scmp.eq.s32.totalorder %s1742_s9, 0 }
   0x8   : > { %p222_p3 = scmp.eq.s32.totalorder %s1200_s10, 1  ;;  %p1201_p5 = scmp.ge.s32.totalorder %s1646_s30, 1 }
   0x9   : > { %p1751_p4 = por %p2132_p1, %p45_p0  ;;  %p229_p7 = scmp.lt.s32.totalorder %s1646_s30, 3 }
   0xa   : > { %p1756_p6 = por %p222_p3, %p45_p0  ;;  %s1660_s14 = smov [#allocation8]  }
   0xb   : > { %s2135_s11 = scalar_select %p1751_p4, 1, 0 }
   0xc   : > { %s2136_s12 = scalar_select %p1756_p6, 1, 0 }
   0xd   : > { %p1761_p8 = pnand %p1201_p5, %p229_p7  ;;  %s256_s15 = sshll.u32 %s1660_s14, 4  ;;  %s1765_s15 = int_to_ptr.vmem [resolvable:$true] %s256_s15 }
   0xe   : > { %s1661_s17 = smov [#allocation10]   ;;  %s1478_s21 = scalar_lea.hbm %s2129_s6, 3072 }
   0xf   : > { %p1331_p9 = pneg %p1761_p8  ;;  %s269_s18 = sshll.u32 %s1661_s17, 4  ;;  %s1776_s18 = int_to_ptr.vmem [resolvable:$true] %s269_s18 }
  0x10   : > { %p1479_p12 = scmp.ne.s32.totalorder %s2129_s6, %s1478_s21  ;;  %p1485_p5 = scmp.lt.u32.totalorder %s1478_s21, %s2129_s6 }
  0x11   : > { %p1772_p11 = pnand %p1331_p9, %p2132_p1 }
  0x13   : > { %p1480_p13 = pneg %p1772_p11 }
  0x15   : > { %p1481_p0 = pnand %p1480_p13, %p1479_p12 }
  0x17   : > { %p1482_p3 = pneg %p1481_p0 }
  0x19   : > { %p1487_p7 = pnand %p1485_p5, %p1482_p3 }
  0x1b   : > { %1490 = shalt.err (!%p1487_p7)
}
  0x1c   : > { %s1491_s26 = scalar_lea.vmem %s1765_s15, 3072  ;;  %p1499_p2 = scmp.lt.s32.totalorder %s1765_s15, %s1765_s15 }
  0x1d   : > { %p1492_p9 = scmp.ne.s32.totalorder %s1765_s15, %s1491_s26  ;;  %p1500_p12 = scmp.lt.s32.totalorder %s1491_s26, %s1491_s26 }
  0x1f   : > { %p1494_p10 = pnand %p1492_p9, %p1480_p13  ;;  %p1501_p0 = por %p1500_p12, %p1499_p2 }
  0x21   : > { %p1495_p1 = pneg %p1494_p10 }
  0x23   : > { %p1502_p6 = pnand %p1501_p0, %p1495_p1 }
  0x25   : > { %1505 = shalt.err (!%p1502_p6)
}
  0x26   : > { %s1662_s10 = smov 192   ;;  %s1663_s14 = smov 12  }
  0x27   : > { %1334 = dma.hbm_to_vmem [thread:$0]  (!%p1772_p11), %s2129_s6, 3072, %s1765_s15, [#allocation9], %s1662_s10, %s1662_s10, %s1663_s14  }
  0x28   : > { %s1506_s22 = scalar_lea.hbm %s2130_s7, 1024 }
  0x29   : > { %p1507_p2 = scmp.ne.s32.totalorder %s2130_s7, %s1506_s22  ;;  %p1513_p10 = scmp.lt.u32.totalorder %s1506_s22, %s2130_s7 }
  0x2b   : > { %p1509_p1 = pnand %p1507_p2, %p1480_p13 }
  0x2d   : > { %p1510_p6 = pneg %p1509_p1 }
  0x2f   : > { %p1515_p3 = pnand %p1513_p10, %p1510_p6 }
  0x31   : > { %1518 = shalt.err (!%p1515_p3)
}
  0x32   : > { %s1519_s15 = scalar_lea.vmem %s1776_s18, 1024  ;;  %p1527_p12 = scmp.lt.s32.totalorder %s1776_s18, %s1776_s18 }
  0x33   : > { %p1520_p5 = scmp.ne.s32.totalorder %s1776_s18, %s1519_s15  ;;  %p1528_p0 = scmp.lt.s32.totalorder %s1519_s15, %s1519_s15 }
  0x35   : > { %p1522_p7 = pnand %p1520_p5, %p1480_p13  ;;  %p1529_p2 = por %p1528_p0, %p1527_p12 }
  0x37   : > { %p1523_p9 = pneg %p1522_p7 }
  0x39   : > { %p1530_p1 = pnand %p1529_p2, %p1523_p9 }
  0x3b   : > { %1533 = shalt.err (!%p1530_p1)
}
  0x3c   : > { %s1664_s10 = smov 64   ;;  %s1665_s14 = smov 4  }
  0x3d   : > { %1337 = dma.hbm_to_vmem [thread:$0]  (!%p1772_p11), %s2130_s7, 1024, %s1776_s18, [#allocation9], %s1664_s10, %s1664_s10, %s1665_s14  }
  0x3e   : > { %s1831_s20 = sadd.s32 1, %s1646_s30   ;;  %s32_s22 = sadd.s32 1, %s1642_s29 }
  0x3f   : > { %s29_s21 = ssub.s32 %s1646_s30, %s1831_s20  ;;  %p39_p6 = scmp.ne.s32.totalorder %s1642_s29, %s1638_s28 }
  0x40   : > { %p30_p13 = scmp.eq.s32.totalorder %s29_s21, 0  ;;  %p40_p10 = scmp.eq.s32.totalorder %s1646_s30, 0 }
  0x41   : > { %p2139_p5 = scmp.eq.s32.totalorder %s1742_s9, 1  ;;  %p1348_p9 = scmp.lt.s32.totalorder %s1646_s30, 2 }
  0x42   : > { %s1840_s23 = scalar_select %p30_p13, %s1642_s29, %s32_s22  }
  0x43   : > { %p41_p3 = por %p40_p10, %p39_p6  ;;  %p1844_p7 = por %p2139_p5, %p39_p6 }
  0x44   : > { %s283_s16 = sand.u32 1, %s1642_s29   ;;  %s1259_s18 = sshll.u32 %s1646_s30, 8 }
  0x45   : > { %s2140_s24 = scalar_select %p1844_p7, 1, 0 }
  0x46   : > { %s1205_s25 = sshll.u32 %s283_s16, 4  ;;  %s1854_s10 = scalar_lea.hbm %s2123_s0, %s1259_s18 }
  0x47   : > { %s287_s14 = scalar_lea.vmem [#allocation5], %s1205_s25  ;;  %p1858_p11 = pnand %p1348_p9, %p41_p3 }
  0x48   : > { %s294_s17 = sshll.u32 %s287_s14, 4  ;;  %s1862_s21 = scalar_lea.sflag [#allocation6], %s283_s16  ;;  %s1856_s17 = int_to_ptr.vmem [resolvable:$true] %s294_s17 }
  0x49   : > { %s1534_s22 = scalar_lea.hbm %s1854_s10, 256  ;;  %p1536_p0 = pneg %p1858_p11 }
  0x4a   : > { %p1535_p12 = scmp.ne.s32.totalorder %s1854_s10, %s1534_s22  ;;  %s1539_s26 = scalar_lea.hbm %s2123_s0, 512 }
  0x4b   : > { %p1540_p13 = scmp.lt.u32.totalorder %s1854_s10, %s2123_s0  ;;  %p1541_p6 = scmp.lt.u32.totalorder %s1539_s26, %s1534_s22 }
  0x4c   : > { %p1537_p2 = pnand %p1536_p0, %p1535_p12  ;;  %p1543_p3 = scmp.lt.u32.totalorder %s1534_s22, %s1854_s10 }
  0x4d   : > { %p1542_p10 = por %p1541_p6, %p1540_p13 }
  0x4e   : > { %p1538_p1 = pneg %p1537_p2 }
  0x4f   : > { %p1544_p5 = por %p1543_p3, %p1542_p10 }
  0x51   : > { %p1545_p9 = pnand %p1544_p5, %p1538_p1 }
  0x53   : > { %1548 = shalt.err (!%p1545_p9)
}
  0x54   : > { %s1549_s16 = scalar_lea.vmem %s1856_s17, 256  ;;  %s1666_s25 = smov [#allocation5]  }
  0x55   : > { %p1550_p12 = scmp.ne.s32.totalorder %s1856_s17, %s1549_s16  ;;  %s1554_s18 = sshll.u32 %s1666_s25, 4  ;;  %s1555_s18 = int_to_ptr.vmem [resolvable:$false] %s1554_s18 }
  0x56   : > { %s1556_s15 = scalar_lea.vmem %s1555_s18, 512  ;;  %p1557_p4 = scmp.lt.s32.totalorder %s1856_s17, %s1555_s18 }
  0x57   : > { %p1552_p2 = pnand %p1550_p12, %p1536_p0  ;;  %p1558_p13 = scmp.lt.s32.totalorder %s1556_s15, %s1549_s16 }
  0x59   : > { %p1553_p7 = pneg %p1552_p2  ;;  %p1559_p6 = por %p1558_p13, %p1557_p4 }
  0x5b   : > { %p1560_p10 = pnand %p1559_p6, %p1553_p7 }
  0x5d   : > { %1563 = shalt.err (!%p1560_p10)
}
  0x5e   : > { %s1667_s22 = smov 128   ;;  %s1668_s26 = smov 8  }
  0x5f   : > { %1341 = dma.hbm_to_vmem [thread:$0]  (!%p1858_p11), %s1854_s10, 256, %s1856_s17, %s1862_s21, %s1667_s22, %s1667_s22, %s1668_s26  }
  0x60   : > { %306 = sbr.rel (%p1761_p8) target bundleno = 673 (0x2a1), region = 52  ;;  %s1893_s14 = sand.u32 (!%p1761_p8), 1, %s1638_s28  }
  0x61   : > { %s1209_s16 = sshll.u32 (!%p1761_p8), %s1893_s14, 4  ;;  %s309_s25 = scalar_lea.sflag (!%p1761_p8), [#allocation6], %s1893_s14 }
  0x62   : > { %s1899_s18 = scalar_lea.vmem (!%p1761_p8), [#allocation5], %s1209_s16  ;;  %p2142_p4 = scmp.ne.s32.totalorder (!%p1761_p8), %s2135_s11, 0 }
  0x67   : > { %1621 = dma.done.wait (%p2142_p4), %s309_s25, 256  }
  0x68   : > { %1623 = vsyncadd (%p2142_p4), %s309_s25, 4294967040  ;;  %p2143_p7 = scmp.eq.s32.totalorder %s1742_s9, 0 }
  0x6a   : > { %1625 = dma.done.wait (%p2143_p7), [#allocation9], 4096   ;;  %p2144_p8 = pmov %p2143_p7 }
  0x6b   : > { %v1669_v0 = vmov 0.0   ;;  %v1670_v1 = vmov 0   ;;  %vm1671_vm0 = vmmov 0   ;;  %v356_v2 = vlaneseq  ;;  %v1915_v3 = vld [vmem:[%s2127_s4] sm:$0x1]  ;;  %v355_v23 = vld [vmem:[%s1899_s18 + $0x8] sm:$0xff] }
  0x6c   : > { %1627 = vsyncadd (%p2144_p8), [#allocation9], 4294963200  ;;  %1279 = vmatprep.subr.bf16.mxu1 %v1669_v0  ;;  %609 = vmatprep.mubr.bf16.mxu0 %v1670_v1  ;;  %v1920_v4 = vld [vmem:[%s2128_s5] ss:$0 sm:$0xff]  ;;  %v1424_v6 = vld [vmem:[#allocation8] ss:$12 sps:$4 sm:$0xff]  }
  0x6d   : > { %1295 = vmatprep.mubr.msk.bf16.mxu1 %vm1671_vm0, %v1669_v0  ;;  %v1422_v5 = vld [vmem:[#allocation8 + $0x4] ss:$12 sps:$4 sm:$0xff]   ;;  %v1425_v7 = vld [vmem:[#allocation8 + $0x1c] ss:$12 sps:$4 sm:$0xff]   ;;  %v1922_v8 = vshrl.u32 %v356_v2, 7  ;;  %v372_v27 = vrot.slane %v355_v23, 7 }
  0x6e   : > { %577 = vmatprep.subr.bf16.mxu0 %v1422_v5  ;;  %v1427_v9 = vld [vmem:[#allocation8 + $0x18] ss:$12 sps:$4 sm:$0xff]   ;;  %v1428_v10 = vld [vmem:[#allocation8 + $0x34] ss:$12 sps:$4 sm:$0xff]   ;;  %v1430_v12 = vld [vmem:[#allocation8 + $0x30] ss:$12 sps:$4 sm:$0xff]  }
  0x6f   : > { %578 = vmatpush1.bf16.msra.mxu0 %v1424_v6  ;;  %v1434_v11 = vld [vmem:[#allocation8 + $0x8] ss:$12 sps:$4 sm:$0xff]   ;;  %v358_v13 = vadd.s32 8, %v1922_v8  ;;  %v1431_v14 = vld [vmem:[#allocation8 + $0x4c] ss:$12 sps:$4 sm:$0xff]   ;;  %vm359_vm1 = vcmp.gt.s32.totalorder %v1922_v8, 0 }
  0x70   : > { %579 = vmatprep.subr.bf16.mxu0 %v1425_v7  ;;  %1280 = vmatpush3.bf16.msra.mxu1 %v1434_v11  ;;  %v1438_v15 = vld [vmem:[#allocation8 + $0x20] ss:$12 sps:$4 sm:$0xff]   ;;  %v1433_v16 = vld [vmem:[#allocation8 + $0x48] ss:$12 sps:$4 sm:$0xff]   ;;  %v1442_v17 = vld [vmem:[#allocation8 + $0x38] ss:$12 sps:$4 sm:$0xff]  }
  0x71   : > { %1281 = vmatprep.subr.bf16.mxu1 %v1669_v0  ;;  %vm366_vm2 = vcmp.lt.s32.totalorder %v358_v13, 15  ;;  %v1435_v18 = vld [vmem:[#allocation8 + $0x64] ss:$12 sps:$4 sm:$0xff]   ;;  %v1437_v19 = vld [vmem:[#allocation8 + $0x60] ss:$12 sps:$4 sm:$0xff]   ;;  %vm373_vm3 = vcmp.lt.s32.totalorder %v1922_v8, 1 }
  0x72   : > { %vm380_vm4 = vcmp.lt.s32.totalorder %v1922_v8, 7  ;;  %v1439_v20 = vld [vmem:[#allocation8 + $0x7c] ss:$12 sps:$4 sm:$0xff]   ;;  %v354_v22 = vld [vmem:[%s1899_s18] sm:$0xff]  ;;  %v1213_v24 = vsel %vm359_vm1, 1.0, %v1669_v0  ;;  %v1214_v25 = vsel %vm366_vm2, 1.0, %v1669_v0 }
  0x73   : > { %580 = vmatpush1.bf16.msra.mxu0 %v1427_v9  ;;  %v1446_v21 = vld [vmem:[#allocation8 + $0x50] ss:$12 sps:$4 sm:$0xff]   ;;  %v371_v26 = vrot.slane %v354_v22, 7  ;;  %v378_v28 = vrot.slane %v354_v22, 1  ;;  %v379_v29 = vrot.slane %v355_v23, 1  ;;  %s1964_s18 = scalar_lea.vmem [#allocation11], %s1209_s16 }
  0x74   : > { %581 = vmatprep.subr.bf16.mxu0 %v1428_v10  ;;  %1282 = vmatpush3.bf16.msra.mxu1 %v1438_v15  ;;  %v1215_v30 = vld [vmem:[%s2124_s1] ss:$0 sm:$0xff]  ;;  %v1441_v31 = vld [vmem:[#allocation8 + $0x78] ss:$12 sps:$4 sm:$0xff]   ;;  %v1450_v35 = vld [vmem:[#allocation8 + $0x68] ss:$12 sps:$4 sm:$0xff]  }
  0x75   : > { %1283 = vmatprep.subr.bf16.mxu1 %v1669_v0  ;;  %v392_v32 = vmul.f32 %v1215_v30, %v354_v22  ;;  %v393_v33 = vmul.f32 %v1215_v30, %v355_v23  ;;  %v1216_v34 = vld [vmem:[%s2125_s2] ss:$0 sm:$0xff]  ;;  %v374_v36 = vsel %vm373_vm3, %v371_v26, %v372_v27  ;;  %v375_v37 = vsel %vm373_vm3, %v372_v27, %v371_v26  ;;  %v1443_v44 = vld [vmem:[#allocation8 + $0x94] ss:$12 sps:$4 sm:$0xff]   ;;  %v1447_v52 = vld [vmem:[#allocation8 + $0xac] ss:$12 sps:$4 sm:$0xff]  }
  0x76   : > { %v381_v38 = vsel %vm380_vm4, %v378_v28, %v379_v29  ;;  %v382_v39 = vsel %vm380_vm4, %v379_v29, %v378_v28  ;;  %v376_v40 = vmul.f32 %v1213_v24, %v375_v37  ;;  %v402_v42 = vmul.f32 %v1216_v34, %v374_v36  ;;  %v1217_v43 = vld [vmem:[%s2126_s3] ss:$0 sm:$0xff]  ;;  %v1451_v51 = vld [vmem:[#allocation8 + $0x80] ss:$12 sps:$4 sm:$0xff]   ;;  %v1449_v55 = vld [vmem:[#allocation8 + $0xa8] ss:$12 sps:$4 sm:$0xff]  }
  0x77   : > { %582 = vmatpush1.bf16.msra.mxu0 %v1430_v12  ;;  %v384_v41 = vmul.f32 %v1214_v25, %v382_v39  ;;  %v412_v47 = vmul.f32 %v1217_v43, %v381_v38  ;;  %v1445_v49 = vld [vmem:[#allocation8 + $0x90] ss:$12 sps:$4 sm:$0xff]   ;;  %v1452_v56 = vld [vmem:[#allocation8 + $0x98] ss:$12 sps:$4 sm:$0xff]   ;;  %v1966_v15 = vmov 0.0   ;;  %s1970_s13 = smov 0  }
  0x78   : > { %583 = vmatprep.subr.bf16.mxu0 %v1431_v14  ;;  %1284 = vmatpush3.bf16.msra.mxu1 %v1442_v17  ;;  %v401_v45 = vmul.f32 %v1216_v34, %v376_v40  ;;  %v404_v46 = vadd.f32 %v402_v42, %v393_v33  ;;  %v1453_v58 = vld [vmem:[#allocation8 + $0xb0] ss:$12 sps:$4 sm:$0xff]  }
  0x79   : > { %1285 = vmatprep.subr.bf16.mxu1 %v1669_v0  ;;  %v413_v48 = vmul.f32 %v1217_v43, %v384_v41 }
  0x7a   : > { %v403_v50 = vadd.f32 %v401_v45, %v392_v32 }
  0x7b   : > { %584 = vmatpush1.bf16.msra.mxu0 %v1433_v16  ;;  %v415_v54 = vadd.f32 %v413_v48, %v404_v46  ;;  %v1968_v16 = vmov 0.0  }
  0x7c   : > { %585 = vmatprep.subr.bf16.mxu0 %v1435_v18  ;;  %1286 = vmatpush3.bf16.msra.mxu1 %v1446_v21  ;;  %v414_v53 = vadd.f32 %v412_v47, %v403_v50 }
  0x7d   : > { %1287 = vmatprep.subr.bf16.mxu1 %v1669_v0 }
  0x7e   : > { %v416_v57 = vpack.c.bf16 %v415_v54, %v414_v53 }
  0x7f   : > { %586 = vmatpush1.bf16.msra.mxu0 %v1437_v19 }
  0x80   : > { %587 = vmatprep.subr.bf16.mxu0 %v1439_v20  ;;  %1288 = vmatpush3.bf16.msra.mxu1 %v1450_v35 }
  0x81   : > { %1289 = vmatprep.subr.bf16.mxu1 %v1669_v0 }
  0x83   : > { %588 = vmatpush1.bf16.msra.mxu0 %v1441_v31 }
  0x84   : > { %589 = vmatprep.subr.bf16.mxu0 %v1443_v44  ;;  %1290 = vmatpush3.bf16.msra.mxu1 %v1451_v51 }
  0x85   : > { %1291 = vmatprep.subr.bf16.mxu1 %v1669_v0 }
  0x87   : > { %590 = vmatpush1.bf16.msra.mxu0 %v1445_v49 }
  0x88   : > { %591 = vmatprep.subr.bf16.mxu0 %v1447_v52  ;;  %1292 = vmatpush3.bf16.msra.mxu1 %v1452_v56 }
  0x89   : > { %1293 = vmatprep.subr.bf16.mxu1 %v1669_v0 }
  0x8b   : > { %592 = vmatpush1.bf16.msra.mxu0 %v1449_v55 }
  0x8c   : > { %1294 = vmatpush3.bf16.msra.mxu1 %v1453_v58 }
  0x8e   : > { %610 = vmatmul.mubr.bf16.vlgmr.msra.gmra.mrb[0].mxu0 %v416_v57 }
  0x8f   : > { %1296 = vmatmul.mubr.bf16.vlgmr.msra.gmra.mrb[0].mxu1 %v416_v57 }
 0x161   : > { %v611_v59 = vpop.f32.mrb[0].mxu0 }
 0x162   : > { %v661_v60 = vmin.f32 %v611_v59, 60.0  ;;  %v613_v61 = vpop.f32.mrb[1].mxu0  ;;  %v1958_v5 = vpop.f32.mrb[0].mxu1 }
 0x163   : > { %v615_v62 = vpop.f32.mrb[2].mxu0  ;;  %v1297_v7 = vpop.f32.mrb[1].mxu1 }
 0x164   : > { %v663_v63 = vmul.f32 1.442695, %v661_v60  ;;  %v662_v1 = vmin.f32 %v615_v62, 60.0  ;;  %v617_v2 = vpop.f32.mrb[3].mxu0  ;;  %v1960_v9 = vpop.f32.mrb[2].mxu1 }
 0x165   : > { %v1298_v10 = vpop.f32.mrb[3].mxu1 }
 0x166   : > { %1454 = vpow2.f32 %v663_v63  ;;  %v665_v6 = vmul.f32 1.442695, %v662_v1 }
 0x168   : > { %1456 = vpow2.f32 %v665_v6 }
 0x170   : > { %v1455_v11 = vpop.eup %1454 }
 0x171   : > { %669 = vst [vmem:[#allocation2] sm:$0xff] %v1455_v11  ;;  %v667_v12 = vmul.f32 %v1455_v11, %v613_v61 }
 0x172   : > { %v1457_v13 = vpop.eup %1456 }
 0x173   : > { %671 = vst [vmem:[#allocation3] sm:$0xff] %v667_v12  ;;  %670 = vst [vmem:[#allocation2 + $0x8] sm:$0xff] %v1457_v13  ;;  %v668_v14 = vmul.f32 %v1457_v13, %v617_v2 }
 0x175   : > { %672 = vst [vmem:[#allocation3 + $0x8] sm:$0xff] %v668_v14 }
 0x176 LB: >> { %v1672_v17 = vmov 1966171168   ;;  %s1980_s16 = sshll.u32 %s1658_s13, 3  ;;  %v688_v19 = vmul.f32 %v1654_v16, %v1915_v3  ;;  %v690_v20 = vmul.f32 %v1650_v15, %v1915_v3  ;;  %v1999_v37 = vsub.s32 0, %v1922_v8  ;;  %s680_s13 = sadd.s32 1, %s1658_s13   ;;  %s1658_s13 = sphi %s1970_s13, %s680_s13   ;;  %v1654_v16 = vphi %v1968_v16, %v829_v16   ;;  %v1650_v15 = vphi %v1966_v15, %v833_v15  }
 0x177   : >> { %v695_v18 = vunpack.c.l.s4 %v1672_v17  ;;  %s684_s10 = scalar_lea.vmem [#allocation2], %s1980_s16  ;;  %s686_s11 = scalar_lea.vmem [#allocation3], %s1980_s16  ;;  %vm876_vm5 = vcmask 1040384   ;;  %vm878_vm6 = vcmask 1041408   ;;  %vm880_vm7 = vcmask 1042432  }
 0x178   : >> { %vm882_vm8 = vcmask 1043456   ;;  %vm884_vm9 = vcmask 1044480   ;;  %vm886_vm10 = vcmask 1045504   ;;  %vm888_vm11 = vcmask 1046528   ;;  %s951_s17 = scalar_lea.vmem [#allocation4], %s1980_s16  ;;  %p677_p11 = scmp.ge.s32.totalorder %s680_s13, 2  }
 0x179   : >> { %v696_v21 = vunpack.c.0.s8 %v695_v18  ;;  %1299 = vmatprep.subr.bf16.mxu0 (%p677_p11), %v1669_v0  ;;  %1315 = vmatprep.mubr.msk.bf16.mxu0 (%p677_p11), %vm1671_vm0, %v1669_v0  ;;  %s1260_s19 = sshll.u32 (%p677_p11), %s1742_s9, 8  ;;  %s1091_s21 = sshll.u32 (%p677_p11), %s1964_s18, 4  ;;  %s2077_s21 = int_to_ptr.vmem [resolvable:$true] %s1091_s21 }
 0x17a   : >> { %v1986_v22 = vld [vmem:[%s684_s10] sm:$0xff]  ;;  %s2075_s26 = scalar_lea.hbm (%p677_p11), %s2131_s8, %s1260_s19  ;;  %s1078_s25 = scalar_lea.sflag (%p677_p11), [#allocation7], %s1893_s14 }
 0x17b   : >> { %v691_v25 = vadd.f32 %v690_v20, %v1986_v22  ;;  %v699_v26 = vsub.s32 %v696_v21, %v1922_v8  ;;  %v779_v39 = vcombine.high %v1986_v22, %v1986_v22  ;;  %s1564_s13 = scalar_lea.vmem (%p677_p11), %s2077_s21, 256  ;;  %p2145_p1 = scmp.ne.s32.totalorder (%p677_p11), %s2140_s24, 0 }
 0x17c   : >> { %v1989_v23 = vld [vmem:[%s686_s11] sm:$0xff]  ;;  %p1565_p0 = scmp.ne.s32.totalorder (%p677_p11), %s2077_s21, %s1564_s13  ;;  %s1673_s9 = smov (%p677_p11), [#allocation11]  }
 0x17d   : >> { %v689_v24 = vadd.f32 %v688_v19, %v1989_v23  ;;  %v700_v27 = vrot.slane %v1989_v23, %v699_v26  ;;  %v726_v28 = vrot.slane %v1986_v22, %v699_v26  ;;  %v718_v30 = vmul.f32 %v691_v25, %v1915_v3  ;;  %s1568_s16 = sshll.u32 (%p677_p11), %s1673_s9, 4  ;;  %s1569_s16 = int_to_ptr.vmem [resolvable:$false] %s1568_s16 }
 0x17e   : >> { %v761_v38 = vcombine.high %v1989_v23, %v1989_v23  ;;  %v894_v46 = vrot.slane %v691_v25, %v1999_v37  ;;  %v786_v48 = vrot.slane %v779_v39, %v699_v26  ;;  %p1566_p3 = pnand (%p677_p11), %p1565_p0, %p2145_p1  ;;  %s1570_s10 = scalar_lea.vmem (%p677_p11), %s1569_s16, 512 }
 0x17f   : >> { %v692_v29 = vmul.f32 %v689_v24, %v1915_v3  ;;  %v701_v31 = vcombine.high %v700_v27, %v700_v27  ;;  %v708_v32 = vrot.slane %v700_v27, %v699_v26  ;;  %v727_v33 = vcombine.high %v726_v28, %v726_v28  ;;  %p1571_p9 = scmp.lt.s32.totalorder (%p677_p11), %s2077_s21, %s1569_s16  ;;  %p1572_p12 = scmp.lt.s32.totalorder (%p677_p11), %s1570_s10, %s1564_s13 }
 0x180   : >> { %v734_v34 = vrot.slane %v726_v28, %v699_v26  ;;  %v768_v47 = vrot.slane %v761_v38, %v699_v26  ;;  %v932_v56 = vsel %vm876_vm5, %v1650_v15, %v894_v46  ;;  %v808_v59 = vcombine.high %v786_v48, %v786_v48  ;;  %p1567_p5 = pneg (%p677_p11), %p1566_p3 }
 0x181   : >> { %v715_v35 = vrot.slane %v701_v31, %v699_v26  ;;  %v741_v36 = vrot.slane %v727_v33, %v699_v26  ;;  %v745_v42 = vcombine.high %v708_v32, %v708_v32  ;;  %v793_v62 = vrot.slane %v786_v48, %v699_v26  ;;  %p1573_p2 = por (%p677_p11), %p1572_p12, %p1571_p9 }
 0x182   : >> { %v749_v43 = vcombine.high %v734_v34, %v734_v34  ;;  %v775_v57 = vrot.slane %v768_v47, %v699_v26  ;;  %v797_v58 = vcombine.high %v768_v47, %v768_v47  ;;  %v838_v1 = vrot.slane %v689_v24, %v1999_v37 }
 0x183   : >> { %v717_v40 = vadd.f32 %v715_v35, %v692_v29  ;;  %v743_v41 = vadd.f32 %v741_v36, %v718_v30  ;;  %v753_v51 = vcombine.high %v715_v35, %v715_v35  ;;  %v757_v52 = vcombine.high %v741_v36, %v741_v36  ;;  %p1574_p13 = pnand (%p677_p11), %p1573_p2, %p1567_p5 }
 0x184   : >> { %v804_v10 = vrot.slane %v797_v58, %v699_v26  ;;  %v815_v11 = vrot.slane %v808_v59, %v699_v26  ;;  %v877_v18 = vsel %vm876_vm5, %v1654_v16, %v838_v1  ;;  %v819_v24 = vcombine.high %v775_v57, %v775_v57  ;;  %v1464_v58 = vld [vmem:[#allocation10 + $0x10] sm:$0xff] (%p677_p11)   ;;  %v1469_v1 = vld [vmem:[#allocation10 + $0x38] sm:$0xff] (%p677_p11)  }
 0x185   : >> { %v744_v44 = vmul.f32 %v717_v40, %v1915_v3  ;;  %v748_v45 = vmul.f32 %v743_v41, %v1915_v3  ;;  %v900_v53 = vrot.slane %v743_v41, %v1999_v37  ;;  %v844_v15 = vrot.slane %v717_v40, %v1999_v37 }
 0x186   : >> { %v823_v29 = vcombine.high %v793_v62, %v793_v62  ;;  %v827_v39 = vcombine.high %v804_v10, %v804_v10  ;;  %v831_v40 = vcombine.high %v815_v11, %v815_v11  ;;  %v1244_v59 = vmul.f32 (%p677_p11), -1.442695, %v1958_v5  ;;  %v1468_v5 = vld [vmem:[#allocation10 + $0x30] sm:$0xff] (%p677_p11)  }
 0x187   : >> { %v747_v49 = vadd.f32 %v745_v42, %v744_v44  ;;  %v751_v50 = vadd.f32 %v749_v43, %v748_v45  ;;  %v933_v2 = vsel %vm878_vm6, %v932_v56, %v900_v53  ;;  %v879_v30 = vsel %vm878_vm6, %v877_v18, %v844_v15 }
 0x188   : >> { %v947_v43 = vmul.f32 %v1920_v4, %v1986_v22  ;;  %v945_v53 = vmul.f32 %v1920_v4, %v1989_v23  ;;  %v1462_v23 = vld [vmem:[#allocation10] sm:$0xff] (%p677_p11)   ;;  %v1467_v4 = vld [vmem:[#allocation10 + $0x28] sm:$0xff] (%p677_p11)  }
 0x189   : >> { %v752_v54 = vmul.f32 %v747_v49, %v1915_v3  ;;  %v756_v55 = vmul.f32 %v751_v50, %v1915_v3  ;;  %v906_v63 = vrot.slane %v751_v50, %v1999_v37  ;;  %v850_v25 = vrot.slane %v747_v49, %v1999_v37  ;;  %1300 = vmatpush3.bf16.msra.mxu0 (%p677_p11), %v1462_v23 }
 0x18a   : > { %1301 = vmatprep.subr.bf16.mxu0 (%p677_p11), %v1669_v0 }
 0x18b   : >> { %v755_v60 = vadd.f32 %v753_v51, %v752_v54  ;;  %v759_v61 = vadd.f32 %v757_v52, %v756_v55  ;;  %v934_v17 = vsel %vm880_vm7, %v933_v2, %v906_v63  ;;  %v881_v35 = vsel %vm880_vm7, %v879_v30, %v850_v25 }
 0x18d   : >> { %v760_v6 = vmul.f32 %v755_v60, %v1915_v3  ;;  %v778_v7 = vmul.f32 %v759_v61, %v1915_v3  ;;  %v912_v12 = vrot.slane %v759_v61, %v1999_v37  ;;  %v856_v31 = vrot.slane %v755_v60, %v1999_v37  ;;  %v1465_v61 = vld [vmem:[#allocation10 + $0x18] sm:$0xff] (%p677_p11)  }
 0x18e   : > { %v1245_v60 = vmul.f32 (%p677_p11), -1.442695, %v1960_v9 }
 0x18f   : >> { %v777_v13 = vadd.f32 %v775_v57, %v760_v6  ;;  %v795_v14 = vadd.f32 %v793_v62, %v778_v7  ;;  %v935_v26 = vsel %vm882_vm8, %v934_v17, %v912_v12  ;;  %v883_v46 = vsel %vm882_vm8, %v881_v35, %v856_v31 }
 0x191   : >> { %v796_v19 = vmul.f32 %v777_v13, %v1915_v3  ;;  %v807_v20 = vmul.f32 %v795_v14, %v1915_v3  ;;  %v918_v21 = vrot.slane %v795_v14, %v1999_v37  ;;  %v862_v41 = vrot.slane %v777_v13, %v1999_v37 }
 0x193   : >> { %v806_v27 = vadd.f32 %v804_v10, %v796_v19  ;;  %v817_v28 = vadd.f32 %v815_v11, %v807_v20  ;;  %v936_v34 = vsel %vm884_vm9, %v935_v26, %v918_v21  ;;  %v885_v50 = vsel %vm884_vm9, %v883_v46, %v862_v41 }
 0x195   : >> { %v818_v16 = vmul.f32 %v806_v27, %v1915_v3  ;;  %v822_v32 = vmul.f32 %v817_v28, %v1915_v3  ;;  %v924_v33 = vrot.slane %v817_v28, %v1999_v37  ;;  %v868_v48 = vrot.slane %v806_v27, %v1999_v37 }
 0x197   : >> { %v821_v36 = vadd.f32 %v819_v24, %v818_v16  ;;  %v825_v38 = vadd.f32 %v823_v29, %v822_v32  ;;  %v937_v42 = vsel %vm886_vm10, %v936_v34, %v924_v33  ;;  %v887_v52 = vsel %vm886_vm10, %v885_v50, %v868_v48 }
 0x199   : >> { %v826_v44 = vmul.f32 %v821_v36, %v1915_v3  ;;  %v830_v45 = vmul.f32 %v825_v38, %v1915_v3  ;;  %v930_v47 = vrot.slane %v825_v38, %v1999_v37  ;;  %v874_v22 = vrot.slane %v821_v36, %v1999_v37  ;;  %v1463_v37 = vld [vmem:[#allocation10 + $0x8] sm:$0xff] (%p677_p11)   ;;  %v1466_v3 = vld [vmem:[#allocation10 + $0x20] sm:$0xff] (%p677_p11)  }
 0x19a   : > { %1302 = vmatpush3.bf16.msra.mxu0 (%p677_p11), %v1463_v37 }
 0x19b   : >> { %v829_v16 = vadd.f32 %v827_v39, %v826_v44   ;;  %v833_v15 = vadd.f32 %v831_v40, %v830_v45   ;;  %v938_v49 = vsel %vm888_vm11, %v937_v42, %v930_v47  ;;  %v889_v54 = vsel %vm888_vm11, %v887_v52, %v874_v22  ;;  %1303 = vmatprep.subr.bf16.mxu0 (%p677_p11), %v1669_v0 }
 0x19c   : >> { %v948_v51 = vadd.f32 %v947_v43, %v938_v49  ;;  %v946_v55 = vadd.f32 %v945_v53, %v889_v54 }
 0x19e   : >> { %1460 = vrcp.f32 %v948_v51  ;;  %1304 = vmatpush3.bf16.msra.mxu0 (%p677_p11), %v1464_v58 }
 0x19f   : > { %1470 = vpow2.f32 (%p677_p11), %v1244_v59  ;;  %1305 = vmatprep.subr.bf16.mxu0 (%p677_p11), %v1669_v0 }
 0x1a0   : > { %1472 = vpow2.f32 (%p677_p11), %v1245_v60 }
 0x1a2   : > { %1306 = vmatpush3.bf16.msra.mxu0 (%p677_p11), %v1465_v61 }
 0x1a3   : > { %1307 = vmatprep.subr.bf16.mxu0 (%p677_p11), %v1669_v0 }
 0x1a5   : > { %679 = sbr.rel (!%p677_p11) target bundleno = 374 (0x176), region = 115 }
 0x1a6   : > { %1308 = vmatpush3.bf16.msra.mxu0 (%p677_p11), %v1466_v3 }
 0x1a7   : > { %1309 = vmatprep.subr.bf16.mxu0 (%p677_p11), %v1669_v0 }
 0x1a8   : >> { %v1461_v56 = vpop.eup %1460 }
 0x1a9   : >> { %v950_v57 = vmul.f32 %v1461_v56, %v946_v55  ;;  %v1471_v8 = vpop.eup (%p677_p11), %1470 }
 0x1aa   : > { %v1473_v62 = vpop.eup (%p677_p11), %1472  ;;  %v959_v63 = vadd.f32 (%p677_p11), 1.0, %v1471_v8  ;;  %1310 = vmatpush3.bf16.msra.mxu0 (%p677_p11), %v1467_v4 }
 0x1ab   : >> { %952 = vst [vmem:[%s951_s17] sm:$0xff] %v950_v57  ;;  %v960_v9 = vadd.f32 (%p677_p11), 1.0, %v1473_v62  ;;  %1311 = vmatprep.subr.bf16.mxu0 (%p677_p11), %v1669_v0 }
 0x1ac   : > { %1474 = vrcp.f32 %v959_v63 }
 0x1ad   : > { %1476 = vrcp.f32 %v960_v9 }
 0x1ae   : > { %1312 = vmatpush3.bf16.msra.mxu0 %v1468_v5 }
 0x1af   : > { %1313 = vmatprep.subr.bf16.mxu0 %v1669_v0 }
 0x1b2   : > { %1314 = vmatpush3.bf16.msra.mxu0 %v1469_v1  ;;  %v965_v2 = vld [vmem:[#allocation4] sm:$0xff]  ;;  %v966_v6 = vld [vmem:[#allocation4 + $0x8] sm:$0xff] }
 0x1b6   : > { %v1475_v7 = vpop.eup %1474 }
 0x1b7   : > { %v1477_v10 = vpop.eup %1476  ;;  %v967_v11 = vmul.f32 %v1475_v7, %v965_v2 }
 0x1b8   : > { %v968_v12 = vmul.f32 %v1477_v10, %v966_v6 }
 0x1ba   : > { %v969_v13 = vpack.c.bf16 %v968_v12, %v967_v11 }
 0x1bc   : > { %1316 = vmatmul.mubr.bf16.vlgmr.msra.gmra.mrb[4].mxu0 %v969_v13 }
 0x28f   : > { %v1068_v14 = vpop.f32.mrb[4].mxu0 }
 0x290   : > { %1075 = vst [vmem:[%s1964_s18] sm:$0xff] %v1068_v14  ;;  %v1317_v0 = vpop.f32.mrb[5].mxu0 }
 0x291   : > { %v1071_v15 = vpop.f32.mrb[6].mxu0 }
 0x292   : > { %1076 = vst [vmem:[%s1964_s18 + $0x8] sm:$0xff] %v1071_v15  ;;  %v1318_v17 = vpop.f32.mrb[7].mxu0 }
 0x293   : > { %1577 = shalt.err (!%p1574_p13)
}
 0x294   : > { %s1578_s18 = scalar_lea.hbm %s2075_s26, 256  ;;  %s1582_s19 = scalar_lea.hbm %s2131_s8, 512 }
 0x295   : > { %p1579_p6 = scmp.ne.s32.totalorder %s2075_s26, %s1578_s18  ;;  %p1583_p7 = scmp.lt.u32.totalorder %s2075_s26, %s2131_s8 }
 0x296   : > { %p1584_p8 = scmp.lt.u32.totalorder %s1582_s19, %s1578_s18  ;;  %p1586_p0 = scmp.lt.u32.totalorder %s1578_s18, %s2075_s26 }
 0x297   : > { %p1580_p10 = pnand %p1579_p6, %p2145_p1 }
 0x298   : > { %p1585_p11 = por %p1584_p8, %p1583_p7 }
 0x299   : > { %p1581_p4 = pneg %p1580_p10 }
 0x29a   : > { %p1587_p3 = por %p1586_p0, %p1585_p11 }
 0x29c   : > { %p1588_p5 = pnand %p1587_p3, %p1581_p4 }
 0x29e   : > { %1591 = shalt.err (!%p1588_p5)
}
 0x29f   : > { %s1674_s13 = smov 128   ;;  %s1675_s9 = smov 8  }
 0x2a0   : > { %1329 = dma.vmem_to_hbm [thread:$0]  (%p2145_p1), %s2077_s21, 256, %s2075_s26, %s1078_s25, %s1674_s13, %s1674_s13, %s1675_s9  }
 0x2a1 PF: > { %s1106_s16 = sand.u32 1, %s1634_s27   ;;  %p2146_p9 = scmp.ne.s32.totalorder %s2136_s12, 0 }
 0x2a2   : > { %p2147_p12 = scmp.ge.s32.totalorder %s1646_s30, 2  ;;  %s1107_s10 = scalar_lea.sflag [#allocation7], %s1106_s16 }
 0x2a4   : > { %p1343_p2 = pnand %p2147_p12, %p2146_p9 }
 0x2a6   : > { %1629 = dma.done.wait (!%p1343_p2), %s1107_s10, 256  }
 0x2a7   : > { %1631 = vsyncadd (!%p1343_p2), %s1107_s10, 4294967040  ;;  %p22_p13 = scmp.ge.s32.totalorder %s1831_s20, 4   ;;  %s2148_s27 = smov %s1638_s28 }
 0x2a8   : > { %s2149_s28 = smov %s1642_s29  ;;  %s2150_s29 = smov %s1840_s23 }
 0x2a9   : > { %s2151_s30 = smov %s1831_s20  ;;  %24 = sbr.rel (!%p22_p13) target bundleno = 6 (0x6), region = 126 }
 0x2b0   :  { %1112 = vsyncpa [#allocation6], 1 }
 0x2b1   :  { %1114 = vsyncpa [#allocation6 + $0x1], 1 }
 0x2b2   :  { %1115 = vsyncpa [#allocation9], 1 }
 0x2b3   :  { %1116 = vsyncpa [#allocation7], 1 }
 0x2b4   :  { %1118 = vsyncpa [#allocation7 + $0x1], 1 }

</bundles_post_ra>
